<compile_context>
chip_gen: v6e
topology: v6e:2x2x1
jax: 0.10.0
libtpu: 0.0.40
codegen_flags: <defaults>
</compile_context>

<pallas_src>
import jax
import jax.numpy as jnp
from jax.experimental import pallas as pl
from jax.experimental.pallas import tpu as pltpu


def _center_loss_kernel(x_ref, c_ref, lbl_ref, o_ref):
    # x_ref  : (TM, D)    f32  block of features
    # c_ref  : (C, D)     f32  full centers table, resident in VMEM across grid
    # lbl_ref: (TM, 1)    i32  labels for this block
    # o_ref  : (1, 1, TM) f32  lane-dense per-sample clamped squared distances
    tm, _ = x_ref.shape
    num_classes = c_ref.shape[0]

    labels = lbl_ref[...]                                            # (TM, 1) i32
    classes = jax.lax.broadcasted_iota(jnp.int32, (tm, num_classes), 1)
    one_hot = (labels == classes).astype(jnp.float32)                # (TM, C)

    # Gather each sample's center row via a one-hot matmul on the idle MXU.
    gathered = jnp.dot(one_hot, c_ref[...],
                       preferred_element_type=jnp.float32)           # (TM, D)

    diff = x_ref[...].astype(jnp.float32) - gathered                 # VPU
    dist = jnp.sum(diff * diff, axis=-1)                             # (TM,) XLU reduce
    o_ref[0, 0, :] = jnp.clip(dist, 1e-12, 1e12)                     # one vectorised clip


def _center_loss_jax(x, centers, labels):
    """Fused pure-JAX path for tiny problems / oversized centers tables."""
    gathered = jnp.take(centers, labels, axis=0)
    d = jnp.sum((x - gathered) ** 2, axis=1)
    return jnp.mean(jnp.clip(d, 1e-12, 1e12))


def center_loss(x, centers, labels, *, block_m=128, force_kernel=False):
    """x: (B, D) f32, centers: (C, D) f32, labels: (B,) int in [0,C) -> scalar f32."""
    x = jnp.asarray(x, jnp.float32)
    centers = jnp.asarray(centers, jnp.float32)
    labels = jnp.asarray(labels, jnp.int32)   # NOTE: assumed in [0, C); OOB labels
                                              # produce an all-zero one-hot row (no fault).
    B, D = x.shape
    C, Dc = centers.shape
    assert D == Dc, "feature dim mismatch"
    assert block_m % 8 == 0 and block_m % 128 == 0, "block_m must be a multiple of 128"

    # VMEM footprint: double-buffered x/label/out blocks + resident centers.
    centers_bytes = C * D * 4
    block_bytes = 2 * (block_m * D + block_m + block_m) * 4
    vmem_needed = centers_bytes + block_bytes

    tiny = (B * D + C * D) * 4 < (256 << 10)     # XLA's fused version wins at this size
    too_big = vmem_needed > (24 << 20)           # v7x-safe resident-centers budget
    # TODO(synk): D-chunked streaming of centers (accumulate partial squared
    # distances per chunk) instead of falling back when C*D*4 exceeds ~24 MiB.
    if (tiny and not force_kernel) or too_big:
        return _center_loss_jax(x, centers, labels)

    nb = pl.cdiv(B, block_m)
    b_pad = nb * block_m
    if b_pad != B:
        x_p = jnp.pad(x, ((0, b_pad - B), (0, 0)))
        labels_p = jnp.pad(labels, (0, b_pad - B))
    else:
        x_p, labels_p = x, labels
    labels_col = labels_p.reshape(b_pad, 1)

    vmem_limit = int(max(32 * 1024 * 1024, 2 * vmem_needed))  # v5e default is only 16 MiB

    per_sample = pl.pallas_call(
        _center_loss_kernel,
        out_shape=jax.ShapeDtypeStruct((nb, 1, block_m), jnp.float32),
        grid=(nb,),
        in_specs=[
            # x block: TM rows per grid step (double-buffered by the pipeline).
            pl.BlockSpec((block_m, D), lambda i: (i, 0)),
            # centers: same block index every step -> loaded once, resident in VMEM.
            pl.BlockSpec((C, D), lambda i: (0, 0)),
            # labels column for this block.
            pl.BlockSpec((block_m, 1), lambda i: (i, 0)),
        ],
        out_specs=pl.BlockSpec((1, 1, block_m), lambda i: (i, 0, 0)),
        compiler_params=pltpu.CompilerParams(
            dimension_semantics=("parallel",),   # megacore sharding on v7x
            vmem_limit_bytes=vmem_limit,
        ),
    )(x_p, centers, labels_col)

    # Drop padded rows and take the mean (tiny XLA reduction), matching dist.mean().
    per_sample = per_sample.reshape(b_pad)[:B]
    return jnp.sum(per_sample) / jnp.float32(B)


def center_loss_ref(x, centers, labels):
    """Pure-JAX reference mirroring the PyTorch forward (expanded distmat form)."""
    B = x.shape[0]
    C = centers.shape[0]
    distmat = (
        jnp.sum(x ** 2, axis=1, keepdims=True)
        + jnp.sum(centers ** 2, axis=1, keepdims=True).T
        - 2.0 * x @ centers.T
    )
    mask = labels[:, None] == jnp.arange(C)[None, :]
    dist = jnp.where(mask, jnp.clip(distmat, 1e-12, 1e12), 0.0)
    return jnp.sum(dist) / B


if __name__ == "__main__":
    num_classes = 16
    feat_dim = 128
    batch = 256          # -> 2 grid blocks of 128 rows (exercises megacore split)

    key = jax.random.PRNGKey(0)
    kx, kc, kl = jax.random.split(key, 3)

    # Deterministic "parameter" init (stand-in for torch.randn in __init__)
    centers = jax.random.normal(kc, (num_classes, feat_dim), dtype=jnp.float32)
    x = jax.random.normal(kx, (batch, feat_dim), dtype=jnp.float32)
    labels = jax.random.randint(kl, (batch,), 0, num_classes, dtype=jnp.int32)

    # Kernel path (forced, since test shapes are small).
    loss = center_loss(x, centers, labels, force_kernel=True)
    jax.block_until_ready(loss)
    ref = center_loss_ref(x, centers, labels)
    assert jnp.allclose(loss, ref, rtol=1e-4, atol=1e-4), (loss, ref)

    # Ragged batch (padding path) through the kernel.
    loss_r = center_loss(x[:200], centers, labels[:200], force_kernel=True)
    jax.block_until_ready(loss_r)
    ref_r = center_loss_ref(x[:200], centers, labels[:200])
    assert jnp.allclose(loss_r, ref_r, rtol=1e-4, atol=1e-4), (loss_r, ref_r)

    # Tiny-problem auto-dispatch (pure-JAX fast path).
    loss_s = center_loss(x[:8, :32], centers[:, :32], labels[:8])
    jax.block_until_ready(loss_s)
    ref_s = center_loss_ref(x[:8, :32], centers[:, :32], labels[:8])
    assert jnp.allclose(loss_s, ref_s, rtol=1e-4, atol=1e-4), (loss_s, ref_s)

    print("KERNEL_OK")
</pallas_src>

<mosaic_0001>
module attributes {stable_mosaic.version = 11 : i64} {
  func.func @_center_loss_kernel(%arg0: i32, %arg1: memref<128x128xf32, #tpu.memory_space<vmem>>, %arg2: memref<16x128xf32, #tpu.memory_space<vmem>>, %arg3: memref<128x1xi32, #tpu.memory_space<vmem>>, %arg4: memref<1x1x128xf32, #tpu.memory_space<vmem>>) attributes {dimension_semantics = [#tpu.dimension_semantics<parallel>], iteration_bounds = array<i64: 2>, scalar_prefetch = 0 : i64, scratch_operands = 0 : i64, tpu.core_type = #tpu.core_type<tc>, window_params = [{transform_indices = @transform_0, window_bounds = array<i64: 128, 128>}, {pipeline_mode = #tpu.pipeline_mode<synchronous>, transform_indices = @transform_1, window_bounds = array<i64: 16, 128>}, {transform_indices = @transform_2, window_bounds = array<i64: 128, 1>}, {transform_indices = @transform_3, window_bounds = array<i64: 1, 1, 128>}]} {
    %c0 = arith.constant 0 : index
    %c0_0 = arith.constant 0 : index
    %0 = vector.load %arg3[%c0, %c0_0] : memref<128x1xi32, #tpu.memory_space<vmem>>, vector<128x1xi32>
    %1 = tpu.iota {dimensions = array<i32: 1>} : vector<128x16xi32>
    %2 = vector.broadcast %0 : vector<128x1xi32> to vector<128x16xi32>
    %3 = arith.cmpi eq, %2, %1 : vector<128x16xi32>
    %4 = arith.extui %3 : vector<128x16xi1> to vector<128x16xi32>
    %5 = arith.sitofp %4 : vector<128x16xi32> to vector<128x16xf32>
    %c0_1 = arith.constant 0 : index
    %c0_2 = arith.constant 0 : index
    %6 = vector.load %arg2[%c0_1, %c0_2] : memref<16x128xf32, #tpu.memory_space<vmem>>, vector<16x128xf32>
    %cst = arith.constant dense<0.000000e+00> : vector<128x128xf32>
    %7 = tpu.matmul %5, %6, %cst {dimension_numbers = #tpu.dot_dimension_numbers<[1], [0], [0], [1], [0, 0, 1, 1], [], []>} : vector<128x16xf32>, vector<16x128xf32>, vector<128x128xf32> -> vector<128x128xf32>
    %c0_3 = arith.constant 0 : index
    %c0_4 = arith.constant 0 : index
    %8 = vector.load %arg1[%c0_3, %c0_4] : memref<128x128xf32, #tpu.memory_space<vmem>>, vector<128x128xf32>
    %9 = arith.subf %8, %7 : vector<128x128xf32>
    %10 = arith.mulf %9, %9 : vector<128x128xf32>
    %cst_5 = arith.constant dense<0.000000e+00> : vector<128xf32>
    %11 = vector.multi_reduction <add>, %10, %cst_5 [1] : vector<128x128xf32> to vector<128xf32>
    %cst_6 = arith.constant 9.99999996E-13 : f32
    %cst_7 = arith.constant 9.99999995E+11 : f32
    %12 = vector.broadcast %cst_6 : f32 to vector<128xf32>
    %13 = arith.maximumf %12, %11 : vector<128xf32>
    %14 = vector.broadcast %cst_7 : f32 to vector<128xf32>
    %15 = arith.minimumf %14, %13 : vector<128xf32>
    %c0_8 = arith.constant 0 : index
    %c0_9 = arith.constant 0 : index
    %c0_10 = arith.constant 0 : index
    %16 = vector.load %arg4[%c0_8, %c0_9, %c0_10] : memref<1x1x128xf32, #tpu.memory_space<vmem>>, vector<1x1x128xf32>
    %17 = vector.shape_cast %16 : vector<1x1x128xf32> to vector<128xf32>
    %18 = vector.shape_cast %15 : vector<128xf32> to vector<1x1x128xf32>
    tpu.vector_store %arg4[%c0_8, %c0_9, %c0_10], %18 {strides = array<i32>} : memref<1x1x128xf32, #tpu.memory_space<vmem>>, vector<1x1x128xf32>,
    return
  }
  func.func @transform_0(%arg0: i32) -> (i32, i32) {
    %c0_i32 = arith.constant 0 : i32
    %c0_i32_0 = arith.constant 0 : i32
    return %arg0, %c0_i32 : i32, i32
  }
  func.func @transform_1(%arg0: i32) -> (i32, i32) {
    %c0_i32 = arith.constant 0 : i32
    %c0_i32_0 = arith.constant 0 : i32
    %c0_i32_1 = arith.constant 0 : i32
    return %c0_i32, %c0_i32_0 : i32, i32
  }
  func.func @transform_2(%arg0: i32) -> (i32, i32) {
    %c0_i32 = arith.constant 0 : i32
    %c0_i32_0 = arith.constant 0 : i32
    return %arg0, %c0_i32 : i32, i32
  }
  func.func @transform_3(%arg0: i32) -> (i32, i32, i32) {
    %c0_i32 = arith.constant 0 : i32
    %c0_i32_0 = arith.constant 0 : i32
    %c0_i32_1 = arith.constant 0 : i32
    return %arg0, %c0_i32, %c0_i32_0 : i32, i32, i32
  }
}

</mosaic_0001>

<bundles_post_ra>
// kernel: tpu_custom_call.1
= control target key start
LH: loop header
LB: loop body
LE: loop exit
PB: predicated region body
PF: predicated region fallthrough
CT: control target
= control target key end

     0   :  { %8 = vsyncpa [#allocation3], 0  ;;  %s1403_s0 = inlined_call_operand.vmem [shape: f32[256,128], index: 0, kind: input, shape index: {}]   ;;  %s1404_s1 = inlined_call_operand.hbm [shape: f32[16,128], index: 1, kind: input, shape index: {}]   ;;  %s1405_s2 = inlined_call_operand.vmem [shape: s32[256,1], index: 2, kind: input, shape index: {}]   ;;  %s1406_s3 = inlined_call_operand.hbm [shape: f32[2,1,128], index: 3, kind: output, shape index: {}]  }
   0x1   :  { %9 = vsyncpa [#allocation4], 0 }
   0x2   :  { %11 = vsyncpa [#allocation4 + $0x1], 0  ;;  %s1117_s12 = smov 0   ;;  %s1119_s13 = smov 0  }
   0x3   :  { %s1121_s14 = smov 0   ;;  %s1123_s15 = smov 0  }
   0x4 LB: > { %s1138_s16 = sadd.s32 4294967295, %s1089_s15   ;;  %s848_s17 = sadd.s32 4294967294, %s1089_s15   ;;  %s1089_s15 = sphi %s1123_s15, %s1414_s15   ;;  %s1085_s14 = sphi %s1121_s14, %s1413_s14   ;;  %s1081_s13 = sphi %s1119_s13, %s1412_s13   ;;  %s1077_s12 = sphi %s1117_s12, %s1411_s12  }
   0x5   : > { %s1142_s18 = sadd.s32 1, %s1089_s15   ;;  %s97_s19 = sadd.s32 1, %s1085_s14 }
   0x6   : > { %s94_s20 = ssub.s32 %s1089_s15, %s1142_s18  ;;  %p107_p0 = scmp.ne.s32.totalorder %s1085_s14, %s1081_s13 }
   0x7   : > { %p95_p1 = scmp.eq.s32.totalorder %s94_s20, 0  ;;  %p108_p2 = scmp.eq.s32.totalorder %s1138_s16, 1 }
   0x8   : > { %p113_p3 = scmp.ne.s32.totalorder %s1081_s13, %s1077_s12  ;;  %p114_p4 = scmp.eq.s32.totalorder %s848_s17, 1 }
   0x9   : > { %s1153_s21 = scalar_select %p95_p1, %s1085_s14, %s97_s19  }
   0xa   : > { %p1155_p5 = por %p108_p2, %p107_p0  ;;  %p1159_p6 = por %p114_p4, %p113_p3 }
   0xb   : > { %p849_p7 = scmp.ge.s32.totalorder %s1089_s15, 1  ;;  %p121_p8 = scmp.lt.s32.totalorder %s1089_s15, 3 }
   0xc   : > { %s1408_s23 = scalar_select %p1159_p6, 1, 0 }
   0xd   : > { %p957_p9 = scmp.eq.s32.totalorder %s1138_s16, 0  ;;  %p1166_p10 = pnand %p849_p7, %p121_p8 }
   0xe   : > { %s1091_s25 = smov [#allocation2]  }
   0xf   : > { %s133_s26 = sshll.u32 %s1091_s25, 4  ;;  %p949_p11 = pneg %p1166_p10  ;;  %s134_s26 = int_to_ptr.vmem [resolvable:$true] %s133_s26 }
  0x10   : > { %s1010_s27 = scalar_lea.vmem %s134_s26, 256  ;;  %p1018_p3 = scmp.lt.s32.totalorder %s134_s26, %s134_s26 }
  0x11   : > { %p950_p12 = pnand %p957_p9, %p949_p11  ;;  %p1011_p0 = scmp.ne.s32.totalorder %s134_s26, %s1010_s27 }
  0x12   : > { %p1019_p4 = scmp.lt.s32.totalorder %s1010_s27, %s1010_s27 }
  0x13   : > { %p1001_p13 = pneg %p950_p12 }
  0x14   : > { %p1020_p6 = por %p1019_p4, %p1018_p3 }
  0x15   : > { %p1013_p1 = pnand %p1011_p0, %p1001_p13 }
  0x17   : > { %p1014_p2 = pneg %p1013_p1 }
  0x19   : > { %p1021_p7 = pnand %p1020_p6, %p1014_p2 }
  0x1b   : > { %1024 = shalt.err (!%p1021_p7)
}
  0x1c   : > { %s1092_s28 = smov 128   ;;  %s1093_s29 = smov 8  }
  0x1d   : > { %952 = dma.hbm_to_vmem [thread:$0]  (!%p950_p12), %s1404_s1, 256, %s134_s26, [#allocation3], %s1092_s28, %s1092_s28, %s1093_s29  }
  0x1e   : > { %167 = sbr.rel (%p1166_p10) target bundleno = 569 (0x239), region = 32 }
  0x23   : > { %1068 = dma.done.wait (%p957_p9), [#allocation3], 256  }
  0x24   : > { %1070 = vsyncadd (%p957_p9), [#allocation3], 4294967040  ;;  %s1184_s5 = sshll.u32 %s1138_s16, 4  ;;  %v1094_v0 = vmov 0   ;;  %v322_v5 = vld [vmem:[#allocation2 + $0x8] sm:$0xff]  ;;  %v321_v6 = vld [vmem:[#allocation2] sm:$0xff]  ;;  %v223_v19 = vlaneseq }
  0x25   : > { %998 = vset.pattern.permute.xlu1 %v1094_v0  ;;  %997 = vset.pattern.permute.xlu0 %v1094_v0  ;;  %p196_p6 = scmp.lt.s32.totalorder %s1184_s5, 31  ;;  %vm323_vm0 = vcmask 130048   ;;  %v1095_v23 = vmov 0.0   ;;  %s193_s19 = sand.u32 1, %s1081_s13  }
  0x26   : > { %911 = vmatprep.subr.mxu0 %v322_v5  ;;  %939 = vmatprep.subr.mxu1 %v322_v5  ;;  %v1215_v20 = vand.u32 127, %v223_v19  ;;  %s194_s20 = scalar_lea.vmem [#allocation5], %s193_s19  ;;  %s1366_s27 = scalar_lea.hbm %s1406_s3, %s1184_s5 }
  0x27   : > { %s1188_s6 = scalar_select %p196_p6, %s1184_s5, 31  ;;  %912 = vmatpush3.msra.mxu0 %v322_v5  ;;  %941 = vmatpush3.msra.mxu1 %v322_v5 }
  0x28   : > { %913 = vmatprep.subr.mxu0 %v321_v6  ;;  %940 = vmatprep.subr.mxu1 %v321_v6  ;;  %s769_s24 = sshll.u32 %s194_s20, 4  ;;  %s757_s28 = scalar_lea.sflag [#allocation4], %s193_s19  ;;  %s770_s24 = int_to_ptr.vmem [resolvable:$true] %s769_s24 }
  0x29   : > { %s855_s7 = sshll.u32 %s1188_s6, 3  ;;  %914 = vmatpush3.msra.mxu0 %v321_v6  ;;  %942 = vmatpush3.msra.mxu1 %v321_v6  ;;  %s1025_s29 = scalar_lea.vmem %s770_s24, 16 }
  0x2a   : > { %s1196_s10 = scalar_lea.vmem %s1405_s2, %s855_s7  ;;  %s1254_s17 = scalar_lea.vmem %s1403_s0, %s855_s7 }
  0x2b   : > { %v209_v1 = vld [vmem:[%s1196_s10 + $0x10] sm:$0xff]  ;;  %v207_v2 = vld [vmem:[%s1196_s10] sm:$0xff]  ;;  %v210_v3 = vld [vmem:[%s1196_s10 + $0x18] sm:$0xff]  ;;  %p1026_p8 = scmp.ne.s32.totalorder %s770_s24, %s1025_s29  ;;  %s1096_s30 = smov [#allocation5]  }
  0x2c   : > { %232 = vperm.xlu1 %998, %v209_v1   ;;  %226 = vperm.xlu0 %997, %v207_v2   ;;  %v208_v4 = vld [vmem:[%s1196_s10 + $0x8] sm:$0xff]  ;;  %v215_v7 = vld [vmem:[%s1196_s10 + $0x40] sm:$0xff]  ;;  %v217_v11 = vld [vmem:[%s1196_s10 + $0x50] sm:$0xff]  ;;  %s1029_s4 = sshll.u32 %s1096_s30, 4  ;;  %s1030_s4 = int_to_ptr.vmem [resolvable:$false] %s1029_s4 }
  0x2d   : > { %v211_v8 = vld [vmem:[%s1196_s10 + $0x20] sm:$0xff]  ;;  %v216_v9 = vld [vmem:[%s1196_s10 + $0x48] sm:$0xff]  ;;  %v213_v12 = vld [vmem:[%s1196_s10 + $0x30] sm:$0xff]  ;;  %p1027_p9 = pnand %p1026_p8, %p1155_p5  ;;  %s1031_s6 = scalar_lea.vmem %s1030_s4, 32 }
  0x2e   : > { %v212_v10 = vld [vmem:[%s1196_s10 + $0x28] sm:$0xff]  ;;  %v218_v13 = vld [vmem:[%s1196_s10 + $0x58] sm:$0xff]  ;;  %v219_v16 = vld [vmem:[%s1196_s10 + $0x60] sm:$0xff]  ;;  %p1032_p11 = scmp.lt.s32.totalorder %s770_s24, %s1030_s4  ;;  %p1033_p12 = scmp.lt.s32.totalorder %s1031_s6, %s1025_s29 }
  0x2f   : > { %v214_v14 = vld [vmem:[%s1196_s10 + $0x38] sm:$0xff]  ;;  %v220_v15 = vld [vmem:[%s1196_s10 + $0x68] sm:$0xff]  ;;  %v221_v18 = vld [vmem:[%s1196_s10 + $0x70] sm:$0xff]  ;;  %p1028_p10 = pneg %p1027_p9 }
  0x30   : > { %235 = vperm.xlu1 %998, %v210_v3   ;;  %229 = vperm.xlu0 %997, %v208_v4   ;;  %v222_v17 = vld [vmem:[%s1196_s10 + $0x78] sm:$0xff]  ;;  %v518_v54 = vld [vmem:[%s1254_s17 + $0x8] sm:$0xff]  ;;  %v517_v61 = vld [vmem:[%s1254_s17] sm:$0xff]  ;;  %p1034_p13 = por %p1033_p12, %p1032_p11 }
  0x31   : > { %v526_v60 = vld [vmem:[%s1254_s17 + $0x48] sm:$0xff]  ;;  %v525_v0 = vld [vmem:[%s1254_s17 + $0x40] sm:$0xff]  ;;  %v520_v6 = vld [vmem:[%s1254_s17 + $0x18] sm:$0xff] }
  0x32   : > { %p1035_p0 = pnand %p1034_p13, %p1028_p10 }
  0x34   : > { %250 = vperm.xlu1 %998, %v215_v7   ;;  %238 = vperm.xlu0 %997, %v211_v8  }
  0x38   : > { %253 = vperm.xlu1 %998, %v216_v9   ;;  %241 = vperm.xlu0 %997, %v212_v10  }
  0x3c   : > { %256 = vperm.xlu1 %998, %v217_v11   ;;  %244 = vperm.xlu0 %997, %v213_v12  }
  0x40   : > { %259 = vperm.xlu1 %998, %v218_v13   ;;  %247 = vperm.xlu0 %997, %v214_v14   ;;  %v528_v13 = vld [vmem:[%s1254_s17 + $0x58] sm:$0xff]  ;;  %v527_v14 = vld [vmem:[%s1254_s17 + $0x50] sm:$0xff] }
  0x44   : > { %265 = vperm.xlu1 %998, %v220_v15   ;;  %262 = vperm.xlu0 %997, %v219_v16   ;;  %v521_v15 = vld [vmem:[%s1254_s17 + $0x20] sm:$0xff] }
  0x48   : > { %271 = vperm.xlu1 %998, %v222_v17   ;;  %268 = vperm.xlu0 %997, %v221_v18  }
  0xa7   : > { %v233_v21 = vpop.permute.xlu1 %232  ;;  %v227_v22 = vpop.permute.xlu0 %226 }
  0xa8   : > { %vm273_vm1 = vcmp.eq.s32.totalorder %v227_v22, %v1215_v20  ;;  %vm275_vm2 = vcmp.eq.s32.totalorder %v233_v21, %v1215_v20 }
  0xa9   : > { %v858_v24 = vsel %vm273_vm1, 1.0, %v1095_v23  ;;  %v860_v28 = vsel %vm275_vm2, 1.0, %v1095_v23  ;;  %vm661_vm2 = vcmask 195712  }
  0xaa   : > { %915 = vmatprep.mubr.msk.f32.mxu0 %vm323_vm0, %v858_v24 }
  0xab   : > { %v236_v25 = vpop.permute.xlu1 %235  ;;  %v230_v26 = vpop.permute.xlu0 %229 }
  0xac   : > { %vm274_vm3 = vcmp.eq.s32.totalorder %v230_v26, %v1215_v20  ;;  %vm276_vm4 = vcmp.eq.s32.totalorder %v236_v25, %v1215_v20 }
  0xad   : > { %v859_v27 = vsel %vm274_vm3, 1.0, %v1095_v23  ;;  %v861_v31 = vsel %vm276_vm4, 1.0, %v1095_v23  ;;  %vm668_vm3 = vcmask 261312   ;;  %vm675_vm4 = vcmask 326912  }
  0xae   : > { %916 = vmatmul.mubr.msk.f32.vlgmr.msra.gmra.mxu0 %vm323_vm0, %v859_v27 }
  0xaf   : > { %v251_v29 = vpop.permute.xlu1 %250  ;;  %918 = vmatprep.mubr.msk.f32.mxu0 %vm323_vm0, %v860_v28  ;;  %v239_v30 = vpop.permute.xlu0 %238  ;;  %v523_v28 = vld [vmem:[%s1254_s17 + $0x30] sm:$0xff] }
  0xb0   : > { %vm281_vm5 = vcmp.eq.s32.totalorder %v251_v29, %v1215_v20  ;;  %vm277_vm6 = vcmp.eq.s32.totalorder %v239_v30, %v1215_v20 }
  0xb1   : > { %v862_v32 = vsel %vm277_vm6, 1.0, %v1095_v23  ;;  %v866_v33 = vsel %vm281_vm5, 1.0, %v1095_v23  ;;  %vm682_vm5 = vcmask 392512   ;;  %vm689_vm6 = vcmask 458112  }
  0xb2   : > { %919 = vmatmul.mubr.msk.f32.gmra.mxu0 %vm323_vm0, %v861_v31  ;;  %927 = vmatprep.mubr.msk.f32.mxu1 %vm323_vm0, %v866_v33 }
  0xb3   : > { %v254_v34 = vpop.permute.xlu1 %253  ;;  %v242_v35 = vpop.permute.xlu0 %241  ;;  %921 = vmatprep.mubr.msk.f32.mxu0 %vm323_vm0, %v862_v32  ;;  %v522_v32 = vld [vmem:[%s1254_s17 + $0x28] sm:$0xff] }
  0xb4   : > { %vm282_vm7 = vcmp.eq.s32.totalorder %v254_v34, %v1215_v20  ;;  %vm278_vm8 = vcmp.eq.s32.totalorder %v242_v35, %v1215_v20  ;;  %v529_v35 = vld [vmem:[%s1254_s17 + $0x60] sm:$0xff] }
  0xb5   : > { %v867_v36 = vsel %vm282_vm7, 1.0, %v1095_v23  ;;  %v863_v37 = vsel %vm278_vm8, 1.0, %v1095_v23  ;;  %vm696_vm7 = vcmask 523712   ;;  %vm703_vm8 = vcmask 589312  }
  0xb6   : > { %922 = vmatmul.mubr.msk.f32.gmra.mxu0 %vm323_vm0, %v863_v37  ;;  %928 = vmatmul.mubr.msk.f32.vlgmr.msra.gmra.mxu1 %vm323_vm0, %v867_v36 }
  0xb7   : > { %v257_v38 = vpop.permute.xlu1 %256  ;;  %v245_v39 = vpop.permute.xlu0 %244 }
  0xb8   : > { %vm283_vm9 = vcmp.eq.s32.totalorder %v257_v38, %v1215_v20  ;;  %vm279_vm10 = vcmp.eq.s32.totalorder %v245_v39, %v1215_v20  ;;  %v524_v39 = vld [vmem:[%s1254_s17 + $0x38] sm:$0xff] }
  0xb9   : > { %v868_v40 = vsel %vm283_vm9, 1.0, %v1095_v23  ;;  %v864_v41 = vsel %vm279_vm10, 1.0, %v1095_v23  ;;  %vm710_vm9 = vcmask 654912   ;;  %vm717_vm10 = vcmask 720512  }
  0xba   : > { %924 = vmatprep.mubr.msk.f32.mxu0 %vm323_vm0, %v864_v41  ;;  %930 = vmatprep.mubr.msk.f32.mxu1 %vm323_vm0, %v868_v40 }
  0xbb   : > { %v260_v42 = vpop.permute.xlu1 %259  ;;  %v248_v43 = vpop.permute.xlu0 %247 }
  0xbc   : > { %vm284_vm11 = vcmp.eq.s32.totalorder %v260_v42, %v1215_v20  ;;  %vm280_vm12 = vcmp.eq.s32.totalorder %v248_v43, %v1215_v20  ;;  %v531_v43 = vld [vmem:[%s1254_s17 + $0x70] sm:$0xff] }
  0xbd   : > { %v869_v44 = vsel %vm284_vm11, 1.0, %v1095_v23  ;;  %v865_v45 = vsel %vm280_vm12, 1.0, %v1095_v23  ;;  %vm724_vm11 = vcmask 786112   ;;  %vm731_vm12 = vcmask 851712  }
  0xbe   : > { %925 = vmatmul.mubr.msk.f32.gmra.mxu0 %vm323_vm0, %v865_v45  ;;  %931 = vmatmul.mubr.msk.f32.gmra.mxu1 %vm323_vm0, %v869_v44 }
  0xbf   : > { %v266_v46 = vpop.permute.xlu1 %265  ;;  %v263_v47 = vpop.permute.xlu0 %262 }
  0xc0   : > { %vm286_vm13 = vcmp.eq.s32.totalorder %v266_v46, %v1215_v20  ;;  %vm285_vm14 = vcmp.eq.s32.totalorder %v263_v47, %v1215_v20  ;;  %v530_v46 = vld [vmem:[%s1254_s17 + $0x68] sm:$0xff] }
  0xc1   : > { %v871_v48 = vsel %vm286_vm13, 1.0, %v1095_v23  ;;  %v870_v49 = vsel %vm285_vm14, 1.0, %v1095_v23  ;;  %vm738_vm13 = vcmask 917312   ;;  %vm745_vm14 = vcmask 982912  }
  0xc2   : > { %933 = vmatprep.mubr.msk.f32.mxu1 %vm323_vm0, %v870_v49 }
  0xc3   : > { %v272_v50 = vpop.permute.xlu1 %271  ;;  %934 = vmatmul.mubr.msk.f32.gmra.mxu1 %vm323_vm0, %v871_v48  ;;  %v269_v51 = vpop.permute.xlu0 %268 }
  0xc4   : > { %vm288_vm15 = vcmp.eq.s32.totalorder %v272_v50, %v1215_v20  ;;  %vm287_vm1 = vcmp.eq.s32.totalorder %v269_v51, %v1215_v20  ;;  %v532_v51 = vld [vmem:[%s1254_s17 + $0x78] sm:$0xff] }
  0xc5   : > { %v873_v52 = vsel %vm288_vm15, 1.0, %v1095_v23  ;;  %v872_v53 = vsel %vm287_vm1, 1.0, %v1095_v23  ;;  %v519_v23 = vld [vmem:[%s1254_s17 + $0x10] sm:$0xff]  ;;  %vm752_vm15 = vcmask 1048512  }
  0xc6   : > { %936 = vmatprep.mubr.msk.f32.mxu1 %vm323_vm0, %v872_v53 }
  0xc7   : > { %937 = vmatmul.mubr.msk.f32.gmra.mxu1 %vm323_vm0, %v873_v52  ;;  %vm654_vm0 = vcmask 130112  }
 0x16e   : > { %v917_v55 = vpop.f32.mrf.mxu0 }
 0x16f   : > { %v534_v56 = vsub.f32 %v518_v54, %v917_v55 }
 0x170   : > { %v438_v57 = vpop.f32.mrf.mxu0 }
 0x171   : > { %v550_v58 = vmul.f32 %v534_v56, %v534_v56  ;;  %v533_v3 = vsub.f32 %v517_v61, %v438_v57  ;;  %v649_v61 = vadd.s32 4294967288, %v1215_v20 }
 0x172   : > { %v920_v59 = vpop.f32.mrf.mxu0 }
 0x173   : > { %567 = vadd.xlane.f32.xlu1 %v550_v58  ;;  %v549_v9 = vmul.f32 %v533_v3, %v533_v3  ;;  %v536_v10 = vsub.f32 %v520_v6, %v920_v59  ;;  %v663_v3 = vadd.s32 4294967272, %v1215_v20 }
 0x174   : > { %v448_v62 = vpop.f32.mrf.mxu0 }
 0x175   : > { %v552_v18 = vmul.f32 %v536_v10, %v536_v10  ;;  %v535_v29 = vsub.f32 %v519_v23, %v448_v62 }
 0x176   : > { %v929_v63 = vpop.f32.mrf.mxu1  ;;  %v923_v7 = vpop.f32.mrf.mxu0 }
 0x177   : > { %v542_v1 = vsub.f32 %v526_v60, %v929_v63  ;;  %v551_v37 = vmul.f32 %v535_v29, %v535_v29  ;;  %v538_v38 = vsub.f32 %v522_v32, %v923_v7  ;;  %v1277_v60 = vshrl.u32 %v223_v19, 7 }
 0x178   : > { %v478_v2 = vpop.f32.mrf.mxu1  ;;  %v458_v11 = vpop.f32.mrf.mxu0  ;;  %v1281_v63 = vadd.s32 4294967224, %v1215_v20  ;;  %v1293_v19 = vadd.s32 4294967208, %v1215_v20 }
 0x179   : > { %v558_v4 = vmul.f32 %v542_v1, %v542_v1  ;;  %v541_v5 = vsub.f32 %v525_v0, %v478_v2  ;;  %v537_v24 = vsub.f32 %v521_v15, %v458_v11  ;;  %v554_v44 = vmul.f32 %v538_v38, %v538_v38 }
 0x17a   : > { %v1284_v0 = vadd.s32 4294967232, %v1215_v20  ;;  %v708_v10 = vsub.s32 %v1281_v63, %v1277_v60 }
 0x17b   : > { %v557_v8 = vmul.f32 %v541_v5, %v541_v5  ;;  %583 = vadd.xlane.f32.xlu0 %v558_v4  ;;  %v553_v33 = vmul.f32 %v537_v24, %v537_v24  ;;  %v1290_v4 = vadd.s32 4294967216, %v1215_v20  ;;  %v652_v5 = vsub.s32 %v649_v61, %v1277_v60 }
 0x17c   : > { %v701_v11 = vsub.s32 %v1284_v0, %v1277_v60  ;;  %v733_v61 = vadd.s32 4294967192, %v1215_v20 }
 0x17d   : > { %581 = vadd.xlane.f32.xlu1 %v557_v8  ;;  %v670_v8 = vadd.s32 4294967264, %v1215_v20 }
 0x17e   : > { %v932_v12 = vpop.f32.mrf.mxu1  ;;  %v926_v16 = vpop.f32.mrf.mxu0 }
 0x17f   : > { %565 = vadd.xlane.f32.xlu0 %v549_v9  ;;  %v544_v21 = vsub.f32 %v528_v13, %v932_v12  ;;  %v540_v45 = vsub.f32 %v524_v39, %v926_v16  ;;  %v656_v9 = vadd.s32 4294967280, %v1215_v20  ;;  %v647_v12 = vsub.s32 %v1215_v20, %v1277_v60 }
 0x180   : > { %v488_v17 = vpop.f32.mrf.mxu1  ;;  %v468_v27 = vpop.f32.mrf.mxu0  ;;  %v684_v16 = vadd.s32 4294967248, %v1215_v20 }
 0x181   : > { %v543_v22 = vsub.f32 %v527_v14, %v488_v17  ;;  %v560_v30 = vmul.f32 %v544_v21, %v544_v21  ;;  %v539_v34 = vsub.f32 %v523_v28, %v468_v27  ;;  %v556_v49 = vmul.f32 %v540_v45, %v540_v45 }
 0x182   : > { %v677_v17 = vadd.s32 4294967256, %v1215_v20  ;;  %v715_v21 = vsub.s32 %v1290_v4, %v1277_v60  ;;  %v1316_v28 = vadd.s32 4294967200, %v1215_v20  ;;  %v1325_v45 = vadd.s32 4294967184, %v1215_v20 }
 0x183   : > { %v559_v25 = vmul.f32 %v543_v22, %v543_v22  ;;  %571 = vadd.xlane.f32.xlu0 %v552_v18  ;;  %v935_v26 = vpop.f32.mrf.mxu1  ;;  %v555_v40 = vmul.f32 %v539_v34, %v539_v34  ;;  %v666_v18 = vsub.s32 %v663_v3, %v1277_v60  ;;  %v722_v22 = vsub.s32 %v1293_v19, %v1277_v60 }
 0x184   : > { %v546_v50 = vsub.f32 %v530_v46, %v935_v26  ;;  %v659_v26 = vsub.s32 %v656_v9, %v1277_v60 }
 0x185   : > { %585 = vadd.xlane.f32.xlu1 %v559_v25  ;;  %v498_v31 = vpop.f32.mrf.mxu1  ;;  %v673_v25 = vsub.s32 %v670_v8, %v1277_v60 }
 0x186   : > { %v545_v41 = vsub.f32 %v529_v35, %v498_v31  ;;  %v562_v53 = vmul.f32 %v546_v50, %v546_v50  ;;  %v680_v35 = vsub.s32 %v677_v17, %v1277_v60 }
 0x187   : > { %587 = vadd.xlane.f32.xlu0 %v560_v30  ;;  %v938_v36 = vpop.f32.mrf.mxu1  ;;  %v691_v30 = vadd.s32 4294967240, %v1215_v20 }
 0x188   : > { %v561_v47 = vmul.f32 %v545_v41, %v545_v41  ;;  %v548_v54 = vsub.f32 %v532_v51, %v938_v36  ;;  %v729_v41 = vsub.s32 %v1316_v28, %v1277_v60 }
 0x189   : > { %573 = vadd.xlane.f32.xlu1 %v553_v33  ;;  %v508_v42 = vpop.f32.mrf.mxu1  ;;  %v687_v33 = vsub.s32 %v684_v16, %v1277_v60 }
 0x18a   : > { %v547_v48 = vsub.f32 %v531_v43, %v508_v42  ;;  %v564_v55 = vmul.f32 %v548_v54, %v548_v54 }
 0x18b   : > { %569 = vadd.xlane.f32.xlu0 %v551_v37 }
 0x18c   : > { %v563_v52 = vmul.f32 %v547_v48, %v547_v48 }
 0x18d   : > { %577 = vadd.xlane.f32.xlu1 %v555_v40 }
 0x18f   : > { %575 = vadd.xlane.f32.xlu0 %v554_v44  ;;  %v694_v44 = vsub.s32 %v691_v30, %v1277_v60 }
 0x191   : > { %589 = vadd.xlane.f32.xlu1 %v561_v47 }
 0x193   : > { %579 = vadd.xlane.f32.xlu0 %v556_v49 }
 0x195   : > { %593 = vadd.xlane.f32.xlu1 %v563_v52 }
 0x197   : > { %591 = vadd.xlane.f32.xlu0 %v562_v53 }
 0x19b   : > { %595 = vadd.xlane.f32.xlu0 %v564_v55 }
 0x1fc   : > { %v568_v56 = vpop.xlane.xlu1 %567 }
 0x1fd   : > { %v598_v6 = vmax.f32 %v568_v56, 1e-12 }
 0x1ff   : > { %v614_v24 = vmin.f32 %v598_v6, 1e+12 }
 0x201   : > { %v653_v38 = vrot.slane %v614_v24, %v652_v5  ;;  %v747_v24 = vadd.s32 4294967176, %v1215_v20 }
 0x204   : > { %v1272_v57 = vpop.xlane.xlu0 %583 }
 0x205   : > { %v606_v50 = vmax.f32 %v1272_v57, 1e-12 }
 0x206   : > { %v1274_v59 = vpop.xlane.xlu1 %581 }
 0x207   : > { %v605_v46 = vmax.f32 %v1274_v59, 1e-12  ;;  %v622_v8 = vmin.f32 %v606_v50, 1e+12 }
 0x208   : > { %v566_v58 = vpop.xlane.xlu0 %565 }
 0x209   : > { %v597_v1 = vmax.f32 %v566_v58, 1e-12  ;;  %v621_v5 = vmin.f32 %v605_v46, 1e+12  ;;  %v709_v28 = vrot.slane %v622_v8, %v708_v10  ;;  %v750_v10 = vsub.s32 %v747_v24, %v1277_v60 }
 0x20b   : > { %v613_v13 = vmin.f32 %v597_v1, 1e+12 }
 0x20c   : > { %v572_v62 = vpop.xlane.xlu0 %571 }
 0x20d   : > { %v600_v14 = vmax.f32 %v572_v62, 1e-12  ;;  %v648_v31 = vrot.slane %v613_v13, %v647_v12  ;;  %v743_v12 = vsub.s32 %v1325_v45, %v1277_v60 }
 0x20e   : > { %v1286_v2 = vpop.xlane.xlu1 %585 }
 0x20f   : > { %v616_v32 = vmin.f32 %v600_v14, 1e+12  ;;  %v655_v47 = vsel %vm654_vm0, %v653_v38, %v648_v31  ;;  %v607_v54 = vmax.f32 %v1286_v2, 1e-12 }
 0x210   : > { %v1296_v7 = vpop.xlane.xlu0 %587 }
 0x211   : > { %v667_v48 = vrot.slane %v616_v32, %v666_v18  ;;  %v608_v59 = vmax.f32 %v1296_v7, 1e-12  ;;  %v623_v13 = vmin.f32 %v607_v54, 1e+12 }
 0x212   : > { %v574_v15 = vpop.xlane.xlu1 %573 }
 0x213   : > { %v601_v23 = vmax.f32 %v574_v15, 1e-12  ;;  %v736_v15 = vsub.s32 %v733_v61, %v1277_v60  ;;  %v624_v17 = vmin.f32 %v608_v59, 1e+12  ;;  %v716_v20 = vrot.slane %v623_v13, %v715_v21 }
 0x214   : > { %v570_v27 = vpop.xlane.xlu0 %569 }
 0x215   : > { %v599_v29 = vmax.f32 %v570_v27, 1e-12  ;;  %v617_v36 = vmin.f32 %v601_v23, 1e+12  ;;  %v723_v32 = vrot.slane %v624_v17, %v722_v22 }
 0x216   : > { %v578_v34 = vpop.xlane.xlu1 %577 }
 0x217   : > { %v615_v37 = vmin.f32 %v599_v29, 1e+12  ;;  %v603_v39 = vmax.f32 %v578_v34, 1e-12  ;;  %v674_v51 = vrot.slane %v617_v36, %v673_v25  ;;  %v702_v25 = vrot.slane %v621_v5, %v701_v11 }
 0x218   : > { %v576_v40 = vpop.xlane.xlu0 %575 }
 0x219   : > { %v660_v42 = vrot.slane %v615_v37, %v659_v26  ;;  %v602_v43 = vmax.f32 %v576_v40, 1e-12  ;;  %v619_v56 = vmin.f32 %v603_v39, 1e+12 }
 0x21a   : > { %v590_v49 = vpop.xlane.xlu1 %589 }
 0x21b   : > { %v662_v52 = vsel %vm661_vm2, %v660_v42, %v655_v47  ;;  %v618_v53 = vmin.f32 %v602_v43, 1e+12  ;;  %v609_v57 = vmax.f32 %v590_v49, 1e-12  ;;  %v688_v14 = vrot.slane %v619_v56, %v687_v33 }
 0x21c   : > { %v669_v55 = vsel %vm668_vm3, %v667_v48, %v662_v52  ;;  %v580_v58 = vpop.xlane.xlu0 %579 }
 0x21d   : > { %v676_v62 = vsel %vm675_vm4, %v674_v51, %v669_v55  ;;  %v681_v1 = vrot.slane %v618_v53, %v680_v35  ;;  %v604_v3 = vmax.f32 %v580_v58, 1e-12  ;;  %v625_v26 = vmin.f32 %v609_v57, 1e+12 }
 0x21e   : > { %v594_v6 = vpop.xlane.xlu1 %593 }
 0x21f   : > { %v683_v2 = vsel %vm682_vm5, %v681_v1, %v676_v62  ;;  %v620_v9 = vmin.f32 %v604_v3, 1e+12  ;;  %v611_v7 = vmax.f32 %v594_v6, 1e-12  ;;  %v730_v34 = vrot.slane %v625_v26, %v729_v41 }
 0x220   : > { %v592_v16 = vpop.xlane.xlu0 %591  ;;  %v690_v27 = vsel %vm689_vm6, %v688_v14, %v683_v2 }
 0x221   : > { %v695_v18 = vrot.slane %v620_v9, %v694_v44  ;;  %v610_v23 = vmax.f32 %v592_v16, 1e-12  ;;  %v627_v11 = vmin.f32 %v611_v7, 1e+12 }
 0x223   : > { %v697_v29 = vsel %vm696_vm7, %v695_v18, %v690_v27  ;;  %v626_v30 = vmin.f32 %v610_v23, 1e+12  ;;  %v744_v19 = vrot.slane %v627_v11, %v743_v12 }
 0x224   : > { %v704_v0 = vsel %vm703_vm8, %v702_v25, %v697_v29  ;;  %v596_v31 = vpop.xlane.xlu0 %595 }
 0x225   : > { %v711_v63 = vsel %vm710_vm9, %v709_v28, %v704_v0  ;;  %v612_v33 = vmax.f32 %v596_v31, 1e-12  ;;  %v737_v21 = vrot.slane %v626_v30, %v736_v15 }
 0x226   : > { %v718_v35 = vsel %vm717_vm10, %v716_v20, %v711_v63 }
 0x227   : > { %v725_v4 = vsel %vm724_vm11, %v723_v32, %v718_v35  ;;  %v628_v36 = vmin.f32 %v612_v33, 1e+12 }
 0x228   : > { %v732_v22 = vsel %vm731_vm12, %v730_v34, %v725_v4 }
 0x229   : > { %v739_v37 = vsel %vm738_vm13, %v737_v21, %v732_v22  ;;  %v751_v60 = vrot.slane %v628_v36, %v750_v10 }
 0x22a   : > { %v746_v38 = vsel %vm745_vm14, %v744_v19, %v739_v37 }
 0x22b   : > { %v753_v39 = vsel %vm752_vm15, %v751_v60, %v746_v38 }
 0x22c   : > { %755 = vst [vmem:[%s194_s20] sm:$0x1] %v753_v39 }
 0x22d   : > { %1038 = shalt.err (!%p1035_p0)
}
 0x22e   : > { %s1039_s5 = scalar_lea.hbm %s1366_s27, 16  ;;  %s1043_s9 = scalar_lea.hbm %s1406_s3, 32 }
 0x22f   : > { %p1040_p1 = scmp.ne.s32.totalorder %s1366_s27, %s1039_s5  ;;  %p1044_p4 = scmp.lt.s32.totalorder %s1366_s27, %s1406_s3 }
 0x230   : > { %p1045_p7 = scmp.lt.s32.totalorder %s1043_s9, %s1039_s5 }
 0x231   : > { %p1041_p2 = pnand %p1040_p1, %p1155_p5 }
 0x232   : > { %p1046_p6 = por %p1045_p7, %p1044_p4 }
 0x233   : > { %p1042_p3 = pneg %p1041_p2 }
 0x235   : > { %p1047_p8 = pnand %p1046_p6, %p1042_p3 }
 0x237   : > { %1050 = shalt.err (!%p1047_p8)
}
 0x238   : > { %947 = dma.vmem_to_hbm [thread:$0]  (%p1155_p5), %s770_s24, 16, %s1366_s27, %s757_s28  }
 0x239 PF: > { %p959_p9 = scmp.ge.s32.totalorder %s1089_s15, 2  ;;  %s781_s16 = sand.u32 1, %s1077_s12  }
 0x23a   : > { %p1410_p10 = scmp.ne.s32.totalorder %s1408_s23, 0  ;;  %s782_s17 = scalar_lea.sflag [#allocation4], %s781_s16 }
 0x23c   : > { %p954_p11 = pnand %p959_p9, %p1410_p10 }
 0x23e   : > { %p955_p12 = pneg %p954_p11 }
 0x240   : > { %1072 = dma.done.wait (%p955_p12), %s782_s17, 16  }
 0x241   : > { %1074 = vsyncadd (%p955_p12), %s782_s17, 4294967280  ;;  %p14_p13 = scmp.ge.s32.totalorder %s1142_s18, 4   ;;  %s1411_s12 = smov %s1081_s13 }
 0x242   : > { %s1412_s13 = smov %s1085_s14  ;;  %s1413_s14 = smov %s1153_s21 }
 0x243   : > { %s1414_s15 = smov %s1142_s18  ;;  %16 = sbr.rel (!%p14_p13) target bundleno = 4 (0x4), region = 75 }
 0x248   :  { %786 = vsyncpa [#allocation3], 1 }
 0x249   :  { %788 = vsyncpa [#allocation3 + $0x1], 1 }
 0x24a   :  { %789 = vsyncpa [#allocation4], 1 }
 0x24b   :  { %791 = vsyncpa [#allocation4 + $0x1], 1 }

</bundles_post_ra>
